<compile_context>
chip_gen: v5e
topology: v5e:2x2
jax: 0.10.0
libtpu: 0.0.40
codegen_flags: <defaults>
</compile_context>

<pallas_src>
import functools
import math

import numpy as np

import jax
import jax.numpy as jnp
from jax.experimental import pallas as pl
from jax.experimental.pallas import tpu as pltpu


# ----------------------------------------------------------------------------
# Fused Pallas kernel: blended/normalised spatial kernel (spak, (K,K)) and
# normalised spectral response (spek1, lane-dense (pan_c, hsi_c)) in one pass.
# ----------------------------------------------------------------------------
def _ssf_kernel(params_ref, spek_t_ref, spak_ref, spek1_t_ref, *, c_hk):
    sigma = params_ref[0]                       # SMEM scalar
    hk = params_ref[1]                          # SMEM scalar
    f_hk = jnp.floor(hk)
    weight = hk - f_hk                          # dynamic blend weight

    K = 2 * c_hk + 1                            # static window size
    iy = jax.lax.broadcasted_iota(jnp.int32, (K, K), 0)
    ix = jax.lax.broadcasted_iota(jnp.int32, (K, K), 1)
    dy = (iy - c_hk).astype(jnp.float32)
    dx = (ix - c_hk).astype(jnp.float32)
    r2 = dy * dy + dx * dx

    # Unnormalized Gaussian: the 1/(2*pi*sigma^2) constant cancels after the
    # divide-by-its-own-sum below, so it is dropped entirely.
    g = jnp.exp(-r2 / (2.0 * sigma * sigma))
    # F.pad(f_k, (1,1,1,1)) on the c_k grid == zero outside the f_hk radius,
    # so the blend collapses to a single select:
    #   inside : g*(1-w) + w*g = g
    #   outside: 0*(1-w) + w*g = w*g
    inside = (jnp.abs(dy) <= f_hk) & (jnp.abs(dx) <= f_hk)
    spak = g * jnp.where(inside, 1.0, weight)

    s = jnp.sum(spak, keepdims=True)            # (1, 1)
    spak_ref[...] = spak * pl.reciprocal(s, approx=False)

    # Spectral response, lane-dense layout (pan_c, hsi_c): per-band sum is a
    # cross-lane reduce over the last axis.
    a = jnp.abs(spek_t_ref[...])                          # (pan_c, hsi_c)
    denom = jnp.sum(a, axis=-1, keepdims=True)            # (pan_c, 1)
    spek1_t_ref[...] = a * pl.reciprocal(denom, approx=False)


# ----------------------------------------------------------------------------
# Wrapper (mirrors SSF.forward).  up_scale is unused in the PyTorch forward.
# ----------------------------------------------------------------------------
def ssf_forward(sigma, half_k, spek, up_scale=None):
    del up_scale  # kept for interface parity; unused in forward
    sigma_f = float(sigma)
    half_k_f = float(half_k)
    f_hk = int(math.floor(half_k_f))
    c_hk = int(math.ceil(half_k_f))
    if c_hk == f_hk:
        # TODO(synk): integer half_k shape-mismatches in the original PyTorch
        # forward as well ((2f+3)^2 vs (2f+1)^2); not supported.
        raise ValueError("half_k must be non-integer (matches PyTorch constraint)")
    K = 2 * c_hk + 1

    hsi_c, pan_c = spek.shape
    params = jnp.asarray([sigma_f, half_k_f], jnp.float32)   # one SMEM operand
    spek_t = jnp.asarray(spek, jnp.float32).T                # (pan_c, hsi_c), lane-dense

    kernel = functools.partial(_ssf_kernel, c_hk=c_hk)
    cost = pl.CostEstimate(
        flops=8 * K * K + 3 * hsi_c * pan_c,
        transcendentals=K * K,
        bytes_accessed=4 * (2 + 2 * hsi_c * pan_c + K * K),
    )

    spak, spek1_t = pl.pallas_call(
        kernel,
        out_shape=(
            jax.ShapeDtypeStruct((K, K), jnp.float32),         # spak (lane-dense, no per-channel stores)
            jax.ShapeDtypeStruct((pan_c, hsi_c), jnp.float32), # spek1, transposed layout
        ),
        in_specs=[
            pl.BlockSpec(memory_space=pltpu.MemorySpace.SMEM),   # [sigma, half_k]
            pl.BlockSpec(memory_space=pltpu.MemorySpace.VMEM),   # spek (pan_c, hsi_c)
        ],
        out_specs=(
            pl.BlockSpec(memory_space=pltpu.MemorySpace.VMEM),
            pl.BlockSpec(memory_space=pltpu.MemorySpace.VMEM),
        ),
        cost_estimate=cost,
    )(params, spek_t)

    # The channel broadcast is a view-like expand in PyTorch; do it outside the
    # kernel so the kernel writes (K,K) once instead of hsi_c masked stores.
    spak1 = jnp.broadcast_to(spak[None, None, :, :], (hsi_c, 1, K, K))
    spek1 = spek1_t.T                                          # back to (hsi_c, pan_c)

    return (spak1, spek1,
            jnp.asarray(half_k_f, jnp.float32),
            jnp.asarray(sigma_f, jnp.float32))


# ----------------------------------------------------------------------------
# NumPy reference mirroring the PyTorch code path exactly (for sanity check).
# ----------------------------------------------------------------------------
def _ssf_ref_numpy(sigma, half_k, spek):
    g15 = np.zeros((15, 15), np.float64)
    for i in range(15):
        for j in range(15):
            tx, ty = i - 7, j - 7
            g15[i, j] = (1.0 / (2.0 * np.pi * sigma ** 2)
                         * np.exp(-(tx ** 2 + ty ** 2) / (2.0 * sigma ** 2)))
    f_hk = int(np.floor(half_k))
    c_hk = int(np.ceil(half_k))
    weight = half_k - f_hk
    f_k = g15[7 - f_hk:7 + f_hk + 1, 7 - f_hk:7 + f_hk + 1]
    c_k = g15[7 - c_hk:7 + c_hk + 1, 7 - c_hk:7 + c_hk + 1]
    f_k = np.pad(f_k, ((1, 1), (1, 1)))
    spak = f_k * (1.0 - weight) + weight * c_k
    spak = spak / spak.sum()
    spak1 = np.broadcast_to(spak[None, None], (spek.shape[0], 1) + spak.shape)
    a = np.abs(spek)
    spek1 = a / a.sum(axis=0, keepdims=True)
    return spak1, spek1


if __name__ == "__main__":
    hsi_c, pan_c, up_scale = 31, 3, 4          # small, module-consistent shapes
    sigma_init = 1.0
    half_k_init = 1.5

    key = jax.random.PRNGKey(0)
    spek = jax.random.uniform(key, (hsi_c, pan_c), jnp.float32)  # torch.rand analog

    spak1, spek1, half_k_out, sigma_out = ssf_forward(
        sigma_init, half_k_init, spek, up_scale=up_scale)
    (spak1, spek1) = jax.block_until_ready((spak1, spek1))

    # sanity check vs the exact PyTorch-path reference
    spak1_ref, spek1_ref = _ssf_ref_numpy(sigma_init, half_k_init, np.asarray(spek))
    assert spak1.shape == (hsi_c, 1, 5, 5)
    assert spek1.shape == (hsi_c, pan_c)
    assert np.allclose(np.asarray(spak1), spak1_ref, atol=1e-5, rtol=1e-5), "spak1 mismatch"
    assert np.allclose(np.asarray(spek1), spek1_ref, atol=1e-5, rtol=1e-5), "spek1 mismatch"
    assert float(half_k_out) == half_k_init and float(sigma_out) == sigma_init

    print("KERNEL_OK")
</pallas_src>

<mosaic_0001>
module attributes {stable_mosaic.version = 11 : i64} {
  func.func @_ssf_kernel(%arg0: memref<2xf32, #tpu.memory_space<smem>>, %arg1: memref<3x31xf32, #tpu.memory_space<vmem>>, %arg2: memref<5x5xf32, #tpu.memory_space<vmem>>, %arg3: memref<3x31xf32, #tpu.memory_space<vmem>>) attributes {dimension_semantics = [], scalar_prefetch = 0 : i64, scratch_operands = 0 : i64, tpu.core_type = #tpu.core_type<tc>} {
    %c0 = arith.constant 0 : index
    %0 = memref.load %arg0[%c0] : memref<2xf32, #tpu.memory_space<smem>>
    %c1 = arith.constant 1 : index
    %1 = memref.load %arg0[%c1] : memref<2xf32, #tpu.memory_space<smem>>
    %2 = math.floor %1 : f32
    %3 = arith.subf %1, %2 : f32
    %4 = tpu.iota {dimensions = array<i32: 0>} : vector<5x5xi32>
    %5 = tpu.iota {dimensions = array<i32: 1>} : vector<5x5xi32>
    %c2_i32 = arith.constant 2 : i32
    %6 = vector.broadcast %c2_i32 : i32 to vector<5x5xi32>
    %7 = arith.subi %4, %6 : vector<5x5xi32>
    %8 = arith.sitofp %7 : vector<5x5xi32> to vector<5x5xf32>
    %c2_i32_0 = arith.constant 2 : i32
    %9 = vector.broadcast %c2_i32_0 : i32 to vector<5x5xi32>
    %10 = arith.subi %5, %9 : vector<5x5xi32>
    %11 = arith.sitofp %10 : vector<5x5xi32> to vector<5x5xf32>
    %12 = arith.mulf %8, %8 : vector<5x5xf32>
    %13 = arith.mulf %11, %11 : vector<5x5xf32>
    %14 = arith.addf %12, %13 : vector<5x5xf32>
    %cst = arith.constant 0.000000e+00 : f32
    %15 = vector.broadcast %cst : f32 to vector<5x5xf32>
    %16 = arith.subf %15, %14 : vector<5x5xf32>
    %cst_1 = arith.constant 2.000000e+00 : f32
    %17 = arith.mulf %cst_1, %0 : f32
    %18 = arith.mulf %17, %0 : f32
    %19 = vector.broadcast %18 : f32 to vector<5x5xf32>
    %20 = arith.divf %16, %19 : vector<5x5xf32>
    %21 = math.exp %20 : vector<5x5xf32>
    %22 = math.absf %8 : vector<5x5xf32>
    %23 = vector.broadcast %2 : f32 to vector<5x5xf32>
    %24 = arith.cmpf ole, %22, %23 : vector<5x5xf32>
    %25 = math.absf %11 : vector<5x5xf32>
    %26 = vector.broadcast %2 : f32 to vector<5x5xf32>
    %27 = arith.cmpf ole, %25, %26 : vector<5x5xf32>
    %28 = arith.andi %24, %27 : vector<5x5xi1>
    %cst_2 = arith.constant 1.000000e+00 : f32
    %29 = vector.broadcast %cst_2 : f32 to vector<5x5xf32>
    %30 = vector.broadcast %3 : f32 to vector<5x5xf32>
    %31 = arith.select %28, %29, %30 : vector<5x5xi1>, vector<5x5xf32>
    %32 = arith.mulf %21, %31 : vector<5x5xf32>
    %33 = vector.shape_cast %32 : vector<5x5xf32> to vector<1x5x5xf32>
    %cst_3 = arith.constant dense<0.000000e+00> : vector<1xf32>
    %34 = vector.multi_reduction <add>, %33, %cst_3 [1, 2] : vector<1x5x5xf32> to vector<1xf32>
    %35 = vector.shape_cast %34 : vector<1xf32> to vector<1x1x1xf32>
    %36 = vector.extract %35[0, 0, 0] : f32 from vector<1x1x1xf32>
    %37 = vector.broadcast %36 : f32 to vector<1x1xf32>
    %38 = tpu.reciprocal %37 : vector<1x1xf32> -> vector<1x1xf32>
    %39 = vector.broadcast %38 : vector<1x1xf32> to vector<5x5xf32>
    %40 = arith.mulf %32, %39 : vector<5x5xf32>
    %c0_4 = arith.constant 0 : index
    %c0_5 = arith.constant 0 : index
    %41 = vector.load %arg2[%c0_4, %c0_5] : memref<5x5xf32, #tpu.memory_space<vmem>>, vector<5x5xf32>
    tpu.vector_store %arg2[%c0_4, %c0_5], %40 {strides = array<i32>} : memref<5x5xf32, #tpu.memory_space<vmem>>, vector<5x5xf32>,
    %c0_6 = arith.constant 0 : index
    %c0_7 = arith.constant 0 : index
    %42 = vector.load %arg1[%c0_6, %c0_7] : memref<3x31xf32, #tpu.memory_space<vmem>>, vector<3x31xf32>
    %43 = math.absf %42 : vector<3x31xf32>
    %cst_8 = arith.constant dense<0.000000e+00> : vector<3xf32>
    %44 = vector.multi_reduction <add>, %43, %cst_8 [1] : vector<3x31xf32> to vector<3xf32>
    %45 = vector.shape_cast %44 : vector<3xf32> to vector<3x1xf32>
    %46 = tpu.reciprocal %45 : vector<3x1xf32> -> vector<3x1xf32>
    %47 = vector.broadcast %46 : vector<3x1xf32> to vector<3x31xf32>
    %48 = arith.mulf %43, %47 : vector<3x31xf32>
    %c0_9 = arith.constant 0 : index
    %c0_10 = arith.constant 0 : index
    %49 = vector.load %arg3[%c0_9, %c0_10] : memref<3x31xf32, #tpu.memory_space<vmem>>, vector<3x31xf32>
    tpu.vector_store %arg3[%c0_9, %c0_10], %48 {strides = array<i32>} : memref<3x31xf32, #tpu.memory_space<vmem>>, vector<3x31xf32>,
    return
  }
}

</mosaic_0001>

<bundles_post_ra>
// kernel: tpu_custom_call.1
= control target key start
LH: loop header
LB: loop body
LE: loop exit
PB: predicated region body
PF: predicated region fallthrough
CT: control target
= control target key end

     0   :  { %9 = vsyncpa [#allocation5], 0  ;;  %s320_s0 = inlined_call_operand.hbm [shape: f32[2], index: 0, kind: input, shape index: {}]   ;;  %s321_s1 = inlined_call_operand.hbm [shape: f32[3,31], index: 1, kind: input, shape index: {}]   ;;  %s322_s2 = inlined_call_operand.hbm [shape: f32[5,5], index: 2, kind: output, shape index: {0}]   ;;  %s323_s3 = inlined_call_operand.hbm [shape: f32[3,31], index: 3, kind: output, shape index: {1}]  }
   0x1   :  { %10 = vsyncpa [#allocation3], 0 }
   0x2   :  { %11 = vsyncpa [#allocation4], 0 }
   0x3   :  { %12 = vsyncpa [#allocation9], 0  ;;  %s18_s14 = sshll.u32 %s320_s0, 4  ;;  %s27_s17 = sshll.u32 %s321_s1, 4  ;;  %s19_s14 = int_to_ptr.hbm [resolvable:$true] %s18_s14  ;;  %s28_s17 = int_to_ptr.hbm [resolvable:$true] %s27_s17 }
   0x4   :  { %s280_s18 = smov [#allocation2]   ;;  %s281_s19 = smov [#allocation6]  }
   0x5   :  { %21 = dma.hbm_to_smem %s19_s14, 16, %s280_s18, [#allocation5]  }
   0x6   :  { %s29_s20 = sshll.u32 %s281_s19, 4  ;;  %s30_s20 = int_to_ptr.vmem [resolvable:$true] %s29_s20 }
   0x7   :  { %32 = dma.hbm_to_vmem [thread:$0]  %s28_s17, 64, %s30_s20, [#allocation3]  }
   0x8   :  { %272 = dma.done.wait [#allocation5], 16  }
   0x9   :  { %273 = vsyncadd [#allocation5], 4294967280 }
   0xa   :  { %274 = dma.done.wait [#allocation3], 64  }
   0xb   :  { %275 = vsyncadd [#allocation3], 4294967232 }
   0xc   :  { %41 = sfence }
   0xd   :  { %s42_s21 = sld [smem:[#allocation2]]  ;;  %v46_v0 = vlaneseq  ;;  %vm87_vm7 = vcmask 36864   ;;  %v115_v31 = vld [vmem:[#allocation6] sm:$0x7]  ;;  %vm117_vm8 = vcmask 247808   ;;  %s282_s25 = smov [#allocation8]  }
   0xe   :  { %s171_s22 = sld [smem:[#allocation2 + $0x1]]  ;;  %v116_v33 = vand.u32 2147483647, %v115_v31  ;;  %s153_s26 = sshll.u32 %s282_s25, 4  ;;  %s154_s26 = int_to_ptr.vmem [resolvable:$true] %s153_s26 }
   0xf   :  { %v47_v1 = vshrl.u32 %v46_v0, 7  ;;  %v49_v2 = vand.u32 127, %v46_v0  ;;  %s155_s29 = sshll.u32 %s323_s3, 4  ;;  %s283_s3 = smov [#allocation7]   ;;  %s156_s29 = int_to_ptr.hbm [resolvable:$true] %s155_s29 }
  0x10   :  { %v118_v34 = vsel %vm117_vm8, %v116_v33, 0.0  ;;  %s142_s4 = sshll.u32 %s283_s3, 4  ;;  %s144_s7 = sshll.u32 %s322_s2, 4  ;;  %s143_s4 = int_to_ptr.vmem [resolvable:$true] %s142_s4  ;;  %s145_s7 = int_to_ptr.hbm [resolvable:$true] %s144_s7 }
  0x11   :  { %v172_v3 = vadd.s32 4294967294, %v47_v1  ;;  %v173_v4 = vadd.s32 4294967294, %v49_v2 }
  0x13   :  { %s58_s0 = smul.f32 2.0, %s42_s21  ;;  %v51_v6 = vcvt.s32.f32 %v172_v3  ;;  %v53_v7 = vcvt.s32.f32 %v173_v4 }
  0x14   :  { %s44_s23 = sfloor.f32 %s171_s22 }
  0x15   :  { %s59_s1 = smul.f32 %s58_s0, %s42_s21  ;;  %v54_v8 = vmul.f32 %v51_v6, %v51_v6  ;;  %v55_v9 = vmul.f32 %v53_v7, %v53_v7  ;;  %v78_v21 = vand.u32 2147483647, %v51_v6  ;;  %v81_v22 = vand.u32 2147483647, %v53_v7  ;;  %s45_s24 = ssub.f32 %s171_s22, %s44_s23 }
  0x16   :  { %v79_v24 = vstv %s44_s23 }
  0x17   :  { %v60_v5 = vstv %s59_s1  ;;  %v56_v12 = vadd.f32 %v55_v9, %v54_v8  ;;  %vm80_vm4 = vcmp.le.f32.partialorder %v78_v21, %v79_v24  ;;  %vm82_vm5 = vcmp.le.f32.partialorder %v81_v22, %v79_v24 }
  0x18   :  { %180 = vrcp.f32 %v60_v5  ;;  %v72_v13 = vand.u32 2147483648, %v60_v5  ;;  %vm66_vm0 = vweird.f32 %v60_v5  ;;  %v70_v15 = vand.u32 2147483647, %v60_v5  ;;  %vm83_vm6 = vmand %vm80_vm4, %vm82_vm5 }
  0x19   :  { %v57_v18 = vsub.f32 0.0, %v56_v12  ;;  %v84_v27 = vstv %s45_s24 }
  0x1a   :  { %v73_v17 = vor.u32 1.1754944e-38, %v72_v13  ;;  %vm71_vm3 = vcmp.eq.f32.partialorder %v70_v15, 8.507059e+37  ;;  %v85_v28 = vsel %vm83_vm6, 1.0, %v84_v27 }
  0x1e   :  { %v181_v10 = vpop.eup %180 }
  0x1f   :  { %v62_v11 = vmul.f32 %v181_v10, %v60_v5  ;;  %vm67_vm1 = vweird.f32 %v181_v10 }
  0x20   :  { %vm68_vm2 = vmor %vm66_vm0, %vm67_vm1 }
  0x21   :  { %v63_v14 = vsub.f32 1.0, %v62_v11 }
  0x23   :  { %v64_v16 = vmul.f32 %v181_v10, %v63_v14 }
  0x25   :  { %v65_v19 = vadd.f32 %v181_v10, %v64_v16 }
  0x27   :  { %v69_v20 = vsel %vm68_vm2, %v181_v10, %v65_v19 }
  0x28   :  { %v74_v23 = vsel %vm71_vm3, %v73_v17, %v69_v20 }
  0x29   :  { %v75_v25 = vmul.f32 %v74_v23, %v57_v18 }
  0x2b   :  { %v76_v26 = vmul.f32 1.442695, %v75_v25 }
  0x2d   :  { %182 = vpow2.f32 %v76_v26 }
  0x33   :  { %v183_v29 = vpop.eup %182 }
  0x34   :  { %v86_v30 = vmul.f32 %v183_v29, %v85_v28 }
  0x36   :  { %v88_v32 = vsel %vm87_vm7, %v86_v30, 0.0 }
  0x37   :  { %89 = vadd.xlane.f32.xlu0 %v88_v32 }
  0x3f   :  { %119 = vadd.xlane.f32.xlu0 %v118_v34 }
  0xaa   :  { %v90_v35 = vpop.xlane.xlu0 %89 }
  0xab   :  { %v91_v36 = vrot.slane %v90_v35, 4 }
  0xad   :  { %v92_v37 = vadd.f32 %v91_v36, %v90_v35 }
  0xaf   :  { %v93_v38 = vrot.slane %v92_v37, 2 }
  0xb1   :  { %v94_v39 = vadd.f32 %v93_v38, %v92_v37 }
  0xb2   :  { %v120_v40 = vpop.xlane.xlu0 %119 }
  0xb3   :  { %v95_v41 = vrot.slane %v94_v39, 1  ;;  %184 = vrcp.f32 %v120_v40  ;;  %v132_v47 = vand.u32 2147483648, %v120_v40  ;;  %vm126_vm9 = vweird.f32 %v120_v40 }
  0xb4   :  { %v130_v48 = vand.u32 2147483647, %v120_v40 }
  0xb5   :  { %v96_v42 = vadd.f32 %v95_v41, %v94_v39  ;;  %v133_v50 = vor.u32 1.1754944e-38, %v132_v47 }
  0xb6   :  { %vm131_vm12 = vcmp.eq.f32.partialorder %v130_v48, 8.507059e+37 }
  0xb7   :  { %174 = vpush %v96_v42 }
  0xb9   :  { %v185_v43 = vpop.eup %184 }
  0xba   :  { %v122_v44 = vmul.f32 %v185_v43, %v120_v40  ;;  %vm127_vm10 = vweird.f32 %v185_v43 }
  0xbb   :  { %vm128_vm11 = vmor %vm126_vm9, %vm127_vm10 }
  0xbc   :  { %v123_v45 = vsub.f32 1.0, %v122_v44 }
  0xbe   :  { %v124_v46 = vmul.f32 %v185_v43, %v123_v45 }
  0xc0   :  { %v125_v49 = vadd.f32 %v185_v43, %v124_v46 }
  0xc2   :  { %v129_v51 = vsel %vm128_vm11, %v185_v43, %v125_v49 }
  0xc3   :  { %v134_v52 = vsel %vm131_vm12, %v133_v50, %v129_v51 }
  0xc4   :  { %v135_v53 = vmul.f32 %v134_v52, %v116_v33 }
  0xc6   :  { %136 = vst.msk [vmem:[#allocation8] sm:$0x7] %vm117_vm8, %v135_v53 }
  0xc7   :  { %158 = dma.vmem_to_hbm [thread:$0]  %s154_s26, 64, %s156_s29, [#allocation9]  }
  0xe8   :  { %s175_s30 = spop %174 }
  0xe9   :  { %v98_v54 = vstv %s175_s30 }
  0xea   :  { %186 = vrcp.f32 %v98_v54  ;;  %v110_v58 = vand.u32 2147483648, %v98_v54  ;;  %v108_v60 = vand.u32 2147483647, %v98_v54  ;;  %vm104_vm14 = vweird.f32 %v98_v54 }
  0xec   :  { %v111_v62 = vor.u32 1.1754944e-38, %v110_v58  ;;  %vm109_vm0 = vcmp.eq.f32.partialorder %v108_v60, 8.507059e+37 }
  0xf0   :  { %v187_v55 = vpop.eup %186 }
  0xf1   :  { %v100_v56 = vmul.f32 %v187_v55, %v98_v54  ;;  %vm105_vm13 = vweird.f32 %v187_v55 }
  0xf2   :  { %vm106_vm15 = vmor %vm104_vm14, %vm105_vm13 }
  0xf3   :  { %v101_v57 = vsub.f32 1.0, %v100_v56 }
  0xf5   :  { %v102_v59 = vmul.f32 %v187_v55, %v101_v57 }
  0xf7   :  { %v103_v61 = vadd.f32 %v187_v55, %v102_v59 }
  0xf9   :  { %v107_v63 = vsel %vm106_vm15, %v187_v55, %v103_v61 }
  0xfa   :  { %v112_v0 = vsel %vm109_vm0, %v111_v62, %v107_v63 }
  0xfb   :  { %v113_v1 = vmul.f32 %v112_v0, %v86_v30 }
  0xfd   :  { %114 = vst.msk [vmem:[#allocation7] sm:$0x1f] %vm87_vm7, %v113_v1 }
  0xfe   :  { %147 = dma.vmem_to_hbm [thread:$0]  %s143_s4, 128, %s145_s7, [#allocation4]  }
  0xff   :  { %276 = dma.done.wait [#allocation4], 128  }
 0x100   :  { %277 = vsyncadd [#allocation4], 4294967168 }
 0x101   :  { %278 = dma.done.wait [#allocation9], 64  }
 0x102   :  { %279 = vsyncadd [#allocation9], 4294967232 }
 0x103   :  { %167 = vsyncpa [#allocation3], 1 }
 0x104   :  { %168 = vsyncpa [#allocation4], 1 }
 0x105   :  { %169 = vsyncpa [#allocation9], 1 }
 0x106   :  { %170 = vsyncpa [#allocation5], 1 }

</bundles_post_ra>
